<compile_context>
chip_gen: v7x
topology: tpu7x:2x2x1
jax: 0.10.0
libtpu: 0.0.40
codegen_flags: <defaults>
</compile_context>

<pallas_src>
import functools

import jax
import jax.numpy as jnp
from jax.experimental import pallas as pl
from jax.experimental.pallas import tpu as pltpu


def _round_up(x, m):
    return ((x + m - 1) // m) * m


def _mlp_kernel(n_layers, compute_dtype, x_ref, *refs):
    """refs = (w0, b0, w1, b1, ..., w_{L-1}, b_{L-1}, out_ref)."""
    out_ref = refs[-1]
    wb = refs[:-1]

    h = x_ref[...]                            # (tile, in_p), compute_dtype
    for i in range(n_layers):
        w = wb[2 * i][...]                    # (fan_in_p, fan_out_p), compute_dtype
        b = wb[2 * i + 1][...]                # (1, fan_out_p), f32
        y = jnp.dot(h, w, preferred_element_type=jnp.float32) + b  # f32 accum
        if i != n_layers - 1:
            y = jnp.maximum(y, 0.0)           # ReLU in f32 on the VPU
            h = y.astype(compute_dtype)       # back to bf16 for the next MXU pass
        else:
            h = y
    out_ref[...] = h.astype(out_ref.dtype)


def _vmem_estimate(tile, in_p, out_p, w_pad, b_pad, item, out_item, widest):
    """Rough per-block VMEM footprint (double-buffered tiles + resident params)."""
    return (2 * tile * in_p * item                      # x double-buffer
            + 2 * tile * out_p * out_item               # out double-buffer
            + 2 * sum(w.size * item for w in w_pad)     # resident weights
            + 2 * sum(b.size * 4 for b in b_pad)        # resident biases
            + 4 * tile * widest * 4)                    # activation headroom (f32)


def visual_goal_encoder(goal_features, weights, biases, *,
                        batch_tile=None, use_bf16=True):
    """MLP forward pass as one Pallas kernel, tiled over the (padded) batch.

    goal_features: (B, in_size) float32
    weights: list of (fan_in, fan_out) float32 arrays (PyTorch W transposed)
    biases:  list of (1, fan_out) float32 arrays
    """
    B, in_size = goal_features.shape
    n_layers = len(weights)
    out_size = weights[-1].shape[1]
    out_dtype = goal_features.dtype
    compute_dtype = jnp.bfloat16 if use_bf16 else out_dtype
    item = 2 if use_bf16 else goal_features.dtype.itemsize
    out_item = goal_features.dtype.itemsize

    # ---- pad every feature dim up to a multiple of 128 (lane-dense) ----
    in_p = _round_up(in_size, 128)
    fan_in_p = in_p
    w_pad, b_pad = [], []
    for w, b in zip(weights, biases):
        fan_out_p = _round_up(w.shape[1], 128)
        w_pad.append(
            jnp.pad(w, ((0, fan_in_p - w.shape[0]),
                        (0, fan_out_p - w.shape[1]))).astype(compute_dtype))
        b_pad.append(
            jnp.pad(b, ((0, 0), (0, fan_out_p - b.shape[1]))).astype(jnp.float32))
        fan_in_p = fan_out_p
    out_p = fan_in_p
    widest = max([in_p] + [w.shape[1] for w in w_pad])

    # ---- batch tiling -------------------------------------------------------
    # Whole batch in one block when small; otherwise the largest row-tile that
    # keeps the per-block footprint well inside the default 32 MiB scoped VMEM.
    vmem_budget = 24 << 20
    b8 = _round_up(B, 8)
    if batch_tile is None:
        candidates = (512, 384, 256, 128)
        batch_tile = candidates[-1]
        for t in candidates:
            if _vmem_estimate(t, in_p, out_p, w_pad, b_pad,
                              item, out_item, widest) <= vmem_budget:
                batch_tile = t
                break
    if b8 <= batch_tile:
        tile, b_padded = b8, b8
    else:
        tile = batch_tile
        b_padded = _round_up(B, batch_tile)

    x = jnp.pad(goal_features,
                ((0, b_padded - B), (0, in_p - in_size))).astype(compute_dtype)

    in_specs = [pl.BlockSpec((tile, in_p), lambda i: (i, 0))]
    wb_args = []
    for w, b in zip(w_pad, b_pad):
        in_specs.append(pl.BlockSpec(w.shape, lambda i: (0, 0)))  # VMEM-resident
        in_specs.append(pl.BlockSpec(b.shape, lambda i: (0, 0)))
        wb_args.extend([w, b])
    out_spec = pl.BlockSpec((tile, out_p), lambda i: (i, 0))      # lane-dense out

    # ---- cost estimate (helps XLA overlap the surrounding graph) ----
    flops = 2 * b_padded * sum(w.shape[0] * w.shape[1] for w in w_pad)
    bytes_accessed = (x.size * item
                      + b_padded * out_p * out_item
                      + sum(w.size * item for w in w_pad)
                      + sum(b.size * 4 for b in b_pad))
    cost = pl.CostEstimate(flops=int(flops), transcendentals=0,
                           bytes_accessed=int(bytes_accessed))

    # ---- compiler params (raise scoped VMEM only if we actually need it) ----
    vmem_needed = _vmem_estimate(tile, in_p, out_p, w_pad, b_pad,
                                 item, out_item, widest)
    cp_kwargs = dict(dimension_semantics=("parallel",))
    if vmem_needed > (32 << 20):
        cp_kwargs["vmem_limit_bytes"] = int(min(vmem_needed, 64 << 20))

    kernel = functools.partial(_mlp_kernel, n_layers, compute_dtype)
    out = pl.pallas_call(
        kernel,
        out_shape=jax.ShapeDtypeStruct((b_padded, out_p), out_dtype),
        grid_spec=pltpu.PrefetchScalarGridSpec(
            num_scalar_prefetch=0,
            grid=(b_padded // tile,),
            in_specs=in_specs,
            out_specs=out_spec,
        ),
        compiler_params=pltpu.CompilerParams(**cp_kwargs),
        cost_estimate=cost,
    )(x, *wb_args)

    return out[:B, :out_size]


def init_params(key, in_size, out_size, hidden_size, depth):
    """Deterministic init matching the layer shapes of VisualGoalEncoder.__init__."""
    sizes = [in_size] + [hidden_size] * (depth + 1) + [out_size]
    weights, biases = [], []
    for li in range(len(sizes) - 1):
        fan_in, fan_out = sizes[li], sizes[li + 1]
        key, kw, kb = jax.random.split(key, 3)
        bound = 1.0 / jnp.sqrt(fan_in)
        weights.append(
            jax.random.uniform(kw, (fan_in, fan_out), jnp.float32, -bound, bound))
        biases.append(
            jax.random.uniform(kb, (1, fan_out), jnp.float32, -bound, bound))
    return weights, biases


def reference_forward(x, weights, biases, use_bf16=True):
    """Pure-JAX reference, mirroring the kernel's bf16 input rounding."""
    if use_bf16:
        cast = lambda a: a.astype(jnp.bfloat16).astype(jnp.float32)
    else:
        cast = lambda a: a
    h = cast(x)
    n = len(weights)
    for i, (w, b) in enumerate(zip(weights, biases)):
        h = jnp.dot(h, cast(w), preferred_element_type=jnp.float32) + b
        if i != n - 1:
            h = cast(jnp.maximum(h, 0.0))
    return h


if __name__ == "__main__":
    # Small, module-consistent shapes.
    in_size, out_size, hidden_size, depth = 32, 16, 64, 2
    batch = 16

    key = jax.random.PRNGKey(0)
    key, kx, kx2 = jax.random.split(key, 3)
    goal_features = jax.random.normal(kx, (batch, in_size), jnp.float32)
    weights, biases = init_params(key, in_size, out_size, hidden_size, depth)

    # Small batch -> single block, grid=(1,)
    out = visual_goal_encoder(goal_features, weights, biases)
    out = jax.block_until_ready(out)
    ref = reference_forward(goal_features, weights, biases)
    assert out.shape == (batch, out_size)
    assert jnp.allclose(out, ref, atol=1e-4, rtol=1e-4)

    # Larger batch with an explicit 128-row tile -> exercises the multi-step
    # grid path and batch padding (320 -> 3 x 128 blocks, last one padded).
    big_batch = 320
    gf2 = jax.random.normal(kx2, (big_batch, in_size), jnp.float32)
    out2 = jax.block_until_ready(
        visual_goal_encoder(gf2, weights, biases, batch_tile=128))
    ref2 = reference_forward(gf2, weights, biases)
    assert out2.shape == (big_batch, out_size)
    assert jnp.allclose(out2, ref2, atol=1e-4, rtol=1e-4)

    # Same large batch through the adaptive-tile default path (single block).
    out3 = jax.block_until_ready(visual_goal_encoder(gf2, weights, biases))
    assert out3.shape == (big_batch, out_size)
    assert jnp.allclose(out3, ref2, atol=1e-4, rtol=1e-4)

    print("KERNEL_OK")
</pallas_src>

<mosaic_0001>
module attributes {stable_mosaic.version = 11 : i64} {
  func.func @_mlp_kernel(%arg0: i32, %arg1: memref<16x128xbf16, #tpu.memory_space<vmem>>, %arg2: memref<128x128xbf16, #tpu.memory_space<vmem>>, %arg3: memref<1x128xf32, #tpu.memory_space<vmem>>, %arg4: memref<128x128xbf16, #tpu.memory_space<vmem>>, %arg5: memref<1x128xf32, #tpu.memory_space<vmem>>, %arg6: memref<128x128xbf16, #tpu.memory_space<vmem>>, %arg7: memref<1x128xf32, #tpu.memory_space<vmem>>, %arg8: memref<128x128xbf16, #tpu.memory_space<vmem>>, %arg9: memref<1x128xf32, #tpu.memory_space<vmem>>, %arg10: memref<16x128xf32, #tpu.memory_space<vmem>>) attributes {dimension_semantics = [#tpu.dimension_semantics<parallel>], iteration_bounds = array<i64: 1>, scalar_prefetch = 0 : i64, scratch_operands = 0 : i64, tpu.core_type = #tpu.core_type<tc>, window_params = [{transform_indices = @transform_0, window_bounds = array<i64: 16, 128>}, {pipeline_mode = #tpu.pipeline_mode<synchronous>, transform_indices = @transform_1, window_bounds = array<i64: 128, 128>}, {pipeline_mode = #tpu.pipeline_mode<synchronous>, transform_indices = @transform_2, window_bounds = array<i64: 1, 128>}, {pipeline_mode = #tpu.pipeline_mode<synchronous>, transform_indices = @transform_3, window_bounds = array<i64: 128, 128>}, {pipeline_mode = #tpu.pipeline_mode<synchronous>, transform_indices = @transform_4, window_bounds = array<i64: 1, 128>}, {pipeline_mode = #tpu.pipeline_mode<synchronous>, transform_indices = @transform_5, window_bounds = array<i64: 128, 128>}, {pipeline_mode = #tpu.pipeline_mode<synchronous>, transform_indices = @transform_6, window_bounds = array<i64: 1, 128>}, {pipeline_mode = #tpu.pipeline_mode<synchronous>, transform_indices = @transform_7, window_bounds = array<i64: 128, 128>}, {pipeline_mode = #tpu.pipeline_mode<synchronous>, transform_indices = @transform_8, window_bounds = array<i64: 1, 128>}, {transform_indices = @transform_9, window_bounds = array<i64: 16, 128>}]} {
    %c0 = arith.constant 0 : index
    %c0_0 = arith.constant 0 : index
    %0 = vector.load %arg1[%c0, %c0_0] : memref<16x128xbf16, #tpu.memory_space<vmem>>, vector<16x128xbf16>
    %c0_1 = arith.constant 0 : index
    %c0_2 = arith.constant 0 : index
    %1 = vector.load %arg2[%c0_1, %c0_2] : memref<128x128xbf16, #tpu.memory_space<vmem>>, vector<128x128xbf16>
    %c0_3 = arith.constant 0 : index
    %c0_4 = arith.constant 0 : index
    %2 = vector.load %arg3[%c0_3, %c0_4] : memref<1x128xf32, #tpu.memory_space<vmem>>, vector<1x128xf32>
    %cst = arith.constant dense<0.000000e+00> : vector<16x128xf32>
    %3 = tpu.matmul %0, %1, %cst {dimension_numbers = #tpu.dot_dimension_numbers<[1], [0], [0], [1], [0, 0, 1, 1], [], []>} : vector<16x128xbf16>, vector<128x128xbf16>, vector<16x128xf32> -> vector<16x128xf32>
    %4 = vector.broadcast %2 : vector<1x128xf32> to vector<16x128xf32>
    %5 = arith.addf %3, %4 : vector<16x128xf32>
    %cst_5 = arith.constant 0.000000e+00 : f32
    %6 = vector.broadcast %cst_5 : f32 to vector<16x128xf32>
    %7 = arith.maximumf %5, %6 : vector<16x128xf32>
    %8 = arith.truncf %7 : vector<16x128xf32> to vector<16x128xbf16>
    %c0_6 = arith.constant 0 : index
    %c0_7 = arith.constant 0 : index
    %9 = vector.load %arg4[%c0_6, %c0_7] : memref<128x128xbf16, #tpu.memory_space<vmem>>, vector<128x128xbf16>
    %c0_8 = arith.constant 0 : index
    %c0_9 = arith.constant 0 : index
    %10 = vector.load %arg5[%c0_8, %c0_9] : memref<1x128xf32, #tpu.memory_space<vmem>>, vector<1x128xf32>
    %cst_10 = arith.constant dense<0.000000e+00> : vector<16x128xf32>
    %11 = tpu.matmul %8, %9, %cst_10 {dimension_numbers = #tpu.dot_dimension_numbers<[1], [0], [0], [1], [0, 0, 1, 1], [], []>} : vector<16x128xbf16>, vector<128x128xbf16>, vector<16x128xf32> -> vector<16x128xf32>
    %12 = vector.broadcast %10 : vector<1x128xf32> to vector<16x128xf32>
    %13 = arith.addf %11, %12 : vector<16x128xf32>
    %cst_11 = arith.constant 0.000000e+00 : f32
    %14 = vector.broadcast %cst_11 : f32 to vector<16x128xf32>
    %15 = arith.maximumf %13, %14 : vector<16x128xf32>
    %16 = arith.truncf %15 : vector<16x128xf32> to vector<16x128xbf16>
    %c0_12 = arith.constant 0 : index
    %c0_13 = arith.constant 0 : index
    %17 = vector.load %arg6[%c0_12, %c0_13] : memref<128x128xbf16, #tpu.memory_space<vmem>>, vector<128x128xbf16>
    %c0_14 = arith.constant 0 : index
    %c0_15 = arith.constant 0 : index
    %18 = vector.load %arg7[%c0_14, %c0_15] : memref<1x128xf32, #tpu.memory_space<vmem>>, vector<1x128xf32>
    %cst_16 = arith.constant dense<0.000000e+00> : vector<16x128xf32>
    %19 = tpu.matmul %16, %17, %cst_16 {dimension_numbers = #tpu.dot_dimension_numbers<[1], [0], [0], [1], [0, 0, 1, 1], [], []>} : vector<16x128xbf16>, vector<128x128xbf16>, vector<16x128xf32> -> vector<16x128xf32>
    %20 = vector.broadcast %18 : vector<1x128xf32> to vector<16x128xf32>
    %21 = arith.addf %19, %20 : vector<16x128xf32>
    %cst_17 = arith.constant 0.000000e+00 : f32
    %22 = vector.broadcast %cst_17 : f32 to vector<16x128xf32>
    %23 = arith.maximumf %21, %22 : vector<16x128xf32>
    %24 = arith.truncf %23 : vector<16x128xf32> to vector<16x128xbf16>
    %c0_18 = arith.constant 0 : index
    %c0_19 = arith.constant 0 : index
    %25 = vector.load %arg8[%c0_18, %c0_19] : memref<128x128xbf16, #tpu.memory_space<vmem>>, vector<128x128xbf16>
    %c0_20 = arith.constant 0 : index
    %c0_21 = arith.constant 0 : index
    %26 = vector.load %arg9[%c0_20, %c0_21] : memref<1x128xf32, #tpu.memory_space<vmem>>, vector<1x128xf32>
    %cst_22 = arith.constant dense<0.000000e+00> : vector<16x128xf32>
    %27 = tpu.matmul %24, %25, %cst_22 {dimension_numbers = #tpu.dot_dimension_numbers<[1], [0], [0], [1], [0, 0, 1, 1], [], []>} : vector<16x128xbf16>, vector<128x128xbf16>, vector<16x128xf32> -> vector<16x128xf32>
    %28 = vector.broadcast %26 : vector<1x128xf32> to vector<16x128xf32>
    %29 = arith.addf %27, %28 : vector<16x128xf32>
    %c0_23 = arith.constant 0 : index
    %c0_24 = arith.constant 0 : index
    %30 = vector.load %arg10[%c0_23, %c0_24] : memref<16x128xf32, #tpu.memory_space<vmem>>, vector<16x128xf32>
    tpu.vector_store %arg10[%c0_23, %c0_24], %29 {strides = array<i32>} : memref<16x128xf32, #tpu.memory_space<vmem>>, vector<16x128xf32>,
    return
  }
  func.func @transform_0(%arg0: i32) -> (i32, i32) {
    %c0_i32 = arith.constant 0 : i32
    %c0_i32_0 = arith.constant 0 : i32
    return %arg0, %c0_i32 : i32, i32
  }
  func.func @transform_1(%arg0: i32) -> (i32, i32) {
    %c0_i32 = arith.constant 0 : i32
    %c0_i32_0 = arith.constant 0 : i32
    %c0_i32_1 = arith.constant 0 : i32
    return %c0_i32, %c0_i32_0 : i32, i32
  }
  func.func @transform_2(%arg0: i32) -> (i32, i32) {
    %c0_i32 = arith.constant 0 : i32
    %c0_i32_0 = arith.constant 0 : i32
    %c0_i32_1 = arith.constant 0 : i32
    return %c0_i32, %c0_i32_0 : i32, i32
  }
  func.func @transform_3(%arg0: i32) -> (i32, i32) {
    %c0_i32 = arith.constant 0 : i32
    %c0_i32_0 = arith.constant 0 : i32
    %c0_i32_1 = arith.constant 0 : i32
    return %c0_i32, %c0_i32_0 : i32, i32
  }
  func.func @transform_4(%arg0: i32) -> (i32, i32) {
    %c0_i32 = arith.constant 0 : i32
    %c0_i32_0 = arith.constant 0 : i32
    %c0_i32_1 = arith.constant 0 : i32
    return %c0_i32, %c0_i32_0 : i32, i32
  }
  func.func @transform_5(%arg0: i32) -> (i32, i32) {
    %c0_i32 = arith.constant 0 : i32
    %c0_i32_0 = arith.constant 0 : i32
    %c0_i32_1 = arith.constant 0 : i32
    return %c0_i32, %c0_i32_0 : i32, i32
  }
  func.func @transform_6(%arg0: i32) -> (i32, i32) {
    %c0_i32 = arith.constant 0 : i32
    %c0_i32_0 = arith.constant 0 : i32
    %c0_i32_1 = arith.constant 0 : i32
    return %c0_i32, %c0_i32_0 : i32, i32
  }
  func.func @transform_7(%arg0: i32) -> (i32, i32) {
    %c0_i32 = arith.constant 0 : i32
    %c0_i32_0 = arith.constant 0 : i32
    %c0_i32_1 = arith.constant 0 : i32
    return %c0_i32, %c0_i32_0 : i32, i32
  }
  func.func @transform_8(%arg0: i32) -> (i32, i32) {
    %c0_i32 = arith.constant 0 : i32
    %c0_i32_0 = arith.constant 0 : i32
    %c0_i32_1 = arith.constant 0 : i32
    return %c0_i32, %c0_i32_0 : i32, i32
  }
  func.func @transform_9(%arg0: i32) -> (i32, i32) {
    %c0_i32 = arith.constant 0 : i32
    %c0_i32_0 = arith.constant 0 : i32
    return %arg0, %c0_i32 : i32, i32
  }
}

</mosaic_0001>

<bundles_post_ra>
// kernel: tpu_custom_call.1
= control target key start
LH: loop header
LB: loop body
LE: loop exit
PB: predicated region body
PF: predicated region fallthrough
CT: control target
= control target key end

     0   :  { %14 = vsyncpa [#allocation3], 0  ;;  %s1141_s0 = inlined_call_operand.hbm [shape: bf16[16,128], index: 0, kind: input, shape index: {}]   ;;  %s1142_s1 = inlined_call_operand.hbm [shape: bf16[128,128], index: 1, kind: input, shape index: {}]   ;;  %s1143_s2 = inlined_call_operand.vmem [shape: f32[1,128], index: 2, kind: input, shape index: {}]   ;;  %s1144_s3 = inlined_call_operand.hbm [shape: bf16[128,128], index: 3, kind: input, shape index: {}]   ;;  %s1145_s4 = inlined_call_operand.vmem [shape: f32[1,128], index: 4, kind: input, shape index: {}]   ;;  %s1146_s5 = inlined_call_operand.hbm [shape: bf16[128,128], index: 5, kind: input, shape index: {}]   ;;  %s1147_s6 = inlined_call_operand.vmem [shape: f32[1,128], index: 6, kind: input, shape index: {}]   ;;  %s1148_s7 = inlined_call_operand.hbm [shape: bf16[128,128], index: 7, kind: input, shape index: {}]   ;;  %s1149_s8 = inlined_call_operand.vmem [shape: f32[1,128], index: 8, kind: input, shape index: {}]   ;;  %s1150_s9 = inlined_call_operand.hbm [shape: f32[16,128], index: 9, kind: output, shape index: {}]  }
   0x1   :  { %15 = vsyncpa [#allocation6], 0 }
   0x2   :  { %16 = vsyncpa [#allocation9], 0 }
   0x3   :  { %17 = vsyncpa [#allocation4], 0  ;;  %s926_s30 = smov [#allocation5]   ;;  %s927_s11 = smov [#allocation8]  }
   0x4   :  { %s35_s10 = sshll.u32 %s926_s30, 4  ;;  %s63_s12 = sshll.u32 %s927_s11, 4  ;;  %s36_s10 = int_to_ptr.vmem [resolvable:$true] %s35_s10  ;;  %s988_s12 = int_to_ptr.vmem [resolvable:$true] %s63_s12 }
   0x5   :  { %s786_s15 = scalar_lea.hbm %s1142_s1, 1024 }
   0x6   :  { %p787_p0 = scmp.ne.s32.totalorder %s1142_s1, %s786_s15  ;;  %p790_p1 = scmp.lt.u32.totalorder %s786_s15, %s1142_s1 }
   0x8   :  { %p792_p2 = pnand %p790_p1, %p787_p0 }
   0xa   :  { %795 = shalt.err (!%p792_p2)
}
   0xb   :  { %s796_s20 = scalar_lea.vmem %s36_s10, 1024  ;;  %p801_p4 = scmp.lt.s32.totalorder %s36_s10, %s36_s10 }
   0xc   :  { %p797_p3 = scmp.ne.s32.totalorder %s36_s10, %s796_s20  ;;  %p802_p5 = scmp.lt.s32.totalorder %s796_s20, %s796_s20 }
   0xe   :  { %p803_p6 = por %p802_p5, %p801_p4 }
  0x10   :  { %p804_p7 = pnand %p803_p6, %p797_p3 }
  0x12   :  { %807 = shalt.err (!%p804_p7)
}
  0x13   :  { %s928_s21 = smov 64   ;;  %s929_s22 = smov 4  }
  0x14   :  { %41 = dma.hbm_to_vmem [thread:$0]  %s1142_s1, 1024, %s36_s10, [#allocation6], %s928_s21, %s928_s21, %s929_s22  }
  0x15   :  { %s808_s27 = scalar_lea.hbm %s1146_s5, 1024 }
  0x16   :  { %p809_p8 = scmp.ne.s32.totalorder %s1146_s5, %s808_s27  ;;  %p812_p9 = scmp.lt.u32.totalorder %s808_s27, %s1146_s5 }
  0x18   :  { %p814_p10 = pnand %p812_p9, %p809_p8 }
  0x1a   :  { %817 = shalt.err (!%p814_p10)
}
  0x1b   :  { %s818_s13 = scalar_lea.vmem %s988_s12, 1024  ;;  %p823_p12 = scmp.lt.s32.totalorder %s988_s12, %s988_s12 }
  0x1c   :  { %p819_p11 = scmp.ne.s32.totalorder %s988_s12, %s818_s13  ;;  %p824_p13 = scmp.lt.s32.totalorder %s818_s13, %s818_s13 }
  0x1e   :  { %p825_p0 = por %p824_p13, %p823_p12 }
  0x20   :  { %p826_p1 = pnand %p825_p0, %p819_p11 }
  0x22   :  { %829 = shalt.err (!%p826_p1)
}
  0x23   :  { %69 = dma.hbm_to_vmem [thread:$0]  %s1146_s5, 1024, %s988_s12, [#allocation9], %s928_s21, %s928_s21, %s929_s22  }
  0x24   :  { %s930_s14 = smov [#allocation2]   ;;  %s931_s16 = smov [#allocation7]  }
  0x25   :  { %s23_s15 = sshll.u32 %s930_s14, 4  ;;  %s49_s17 = sshll.u32 %s931_s16, 4  ;;  %s24_s15 = int_to_ptr.vmem [resolvable:$true] %s23_s15  ;;  %s1025_s17 = int_to_ptr.vmem [resolvable:$true] %s49_s17 }
  0x26   :  { %s830_s20 = scalar_lea.hbm %s1141_s0, 128 }
  0x27   :  { %p831_p2 = scmp.ne.s32.totalorder %s1141_s0, %s830_s20  ;;  %p834_p3 = scmp.lt.u32.totalorder %s830_s20, %s1141_s0 }
  0x29   :  { %p836_p4 = pnand %p834_p3, %p831_p2 }
  0x2b   :  { %839 = shalt.err (!%p836_p4)
}
  0x2c   :  { %s840_s5 = scalar_lea.vmem %s24_s15, 128  ;;  %p845_p6 = scmp.lt.s32.totalorder %s24_s15, %s24_s15 }
  0x2d   :  { %p841_p5 = scmp.ne.s32.totalorder %s24_s15, %s840_s5  ;;  %p846_p7 = scmp.lt.s32.totalorder %s840_s5, %s840_s5 }
  0x2f   :  { %p847_p8 = por %p846_p7, %p845_p6 }
  0x31   :  { %p848_p9 = pnand %p847_p8, %p841_p5 }
  0x33   :  { %851 = shalt.err (!%p848_p9)
}
  0x34   :  { %29 = dma.hbm_to_vmem [thread:$0]  %s1141_s0, 128, %s24_s15, [#allocation3], %s928_s21, %s928_s21, %s929_s22  }
  0x35   :  { %s852_s30 = scalar_lea.hbm %s1144_s3, 1024 }
  0x36   :  { %p853_p10 = scmp.ne.s32.totalorder %s1144_s3, %s852_s30  ;;  %p856_p11 = scmp.lt.u32.totalorder %s852_s30, %s1144_s3 }
  0x38   :  { %p858_p12 = pnand %p856_p11, %p853_p10 }
  0x3a   :  { %861 = shalt.err (!%p858_p12)
}
  0x3b   :  { %s862_s14 = scalar_lea.vmem %s1025_s17, 1024  ;;  %p867_p0 = scmp.lt.s32.totalorder %s1025_s17, %s1025_s17 }
  0x3c   :  { %p863_p13 = scmp.ne.s32.totalorder %s1025_s17, %s862_s14  ;;  %p868_p1 = scmp.lt.s32.totalorder %s862_s14, %s862_s14 }
  0x3e   :  { %p869_p2 = por %p868_p1, %p867_p0 }
  0x40   :  { %p870_p3 = pnand %p869_p2, %p863_p13 }
  0x42   :  { %873 = shalt.err (!%p870_p3)
}
  0x43   :  { %55 = dma.hbm_to_vmem [thread:$0]  %s1144_s3, 1024, %s1025_s17, [#allocation6], %s928_s21, %s928_s21, %s929_s22  }
  0x44   :  { %s932_s16 = smov [#allocation10]   ;;  %s874_s23 = scalar_lea.hbm %s1148_s7, 1024 }
  0x45   :  { %s77_s18 = sshll.u32 %s932_s16, 4  ;;  %p875_p4 = scmp.ne.s32.totalorder %s1148_s7, %s874_s23  ;;  %s78_s18 = int_to_ptr.vmem [resolvable:$true] %s77_s18 }
  0x46   :  { %p878_p5 = scmp.lt.u32.totalorder %s874_s23, %s1148_s7 }
  0x48   :  { %p880_p6 = pnand %p878_p5, %p875_p4 }
  0x4a   :  { %883 = shalt.err (!%p880_p6)
}
  0x4b   :  { %s884_s12 = scalar_lea.vmem %s78_s18, 1024  ;;  %p889_p8 = scmp.lt.s32.totalorder %s78_s18, %s78_s18 }
  0x4c   :  { %p885_p7 = scmp.ne.s32.totalorder %s78_s18, %s884_s12  ;;  %p890_p9 = scmp.lt.s32.totalorder %s884_s12, %s884_s12 }
  0x4e   :  { %p891_p10 = por %p890_p9, %p889_p8 }
  0x50   :  { %p892_p11 = pnand %p891_p10, %p885_p7 }
  0x52   :  { %895 = shalt.err (!%p892_p11)
}
  0x53   :  { %83 = dma.hbm_to_vmem [thread:$0]  %s1148_s7, 1024, %s78_s18, [#allocation9], %s928_s21, %s928_s21, %s929_s22  }
  0x54   :  { %918 = dma.done.wait [#allocation3], 128  }
  0x55   :  { %919 = vsyncadd [#allocation3], 4294967168 }
  0x56   :  { %920 = dma.done.wait [#allocation6], 2048  }
  0x57   :  { %921 = vsyncadd [#allocation6], 4294965248 }
  0x58   :  { %922 = dma.done.wait [#allocation9], 2048  }
  0x59   :  { %923 = vsyncadd [#allocation9], 4294965248  ;;  %v933_v0 = vmov 0.0   ;;  %vm934_vm0 = vmmov 0   ;;  %v753_v1 = vld [vmem:[#allocation5] sm:$0xff]   ;;  %v754_v2 = vld [vmem:[#allocation5 + $0x8] sm:$0xff]  }
  0x5a   :  { %661 = vmatprep.subr.bf16.mxu0 %v933_v0  ;;  %677 = vmatprep.mubr.msk.bf16.mxu0 %vm934_vm0, %v933_v0  ;;  %v755_v3 = vld [vmem:[#allocation5 + $0x10] sm:$0xff]   ;;  %v762_v4 = vld [vmem:[#allocation7] sm:$0xff]   ;;  %v756_v5 = vld [vmem:[#allocation5 + $0x18] sm:$0xff]   ;;  %s935_s30 = smov [#allocation11]  }
  0x5b   :  { %681 = vmatprep.subr.bf16.mxu1 %v933_v0  ;;  %697 = vmatprep.mubr.msk.bf16.mxu1 %vm934_vm0, %v933_v0  ;;  %v763_v6 = vld [vmem:[#allocation7 + $0x8] sm:$0xff]   ;;  %v757_v7 = vld [vmem:[#allocation5 + $0x20] sm:$0xff]   ;;  %v764_v8 = vld [vmem:[#allocation7 + $0x10] sm:$0xff]   ;;  %s574_s11 = sshll.u32 %s935_s30, 4  ;;  %s575_s11 = int_to_ptr.vmem [resolvable:$true] %s574_s11 }
  0x5c   :  { %662 = vmatpush3.bf16.msra.mxu0 %v753_v1  ;;  %682 = vmatpush3.bf16.msra.mxu1 %v762_v4  ;;  %v758_v9 = vld [vmem:[#allocation5 + $0x28] sm:$0xff]   ;;  %v765_v10 = vld [vmem:[#allocation7 + $0x18] sm:$0xff]   ;;  %v759_v11 = vld [vmem:[#allocation5 + $0x30] sm:$0xff]   ;;  %p901_p13 = scmp.lt.s32.totalorder %s575_s11, %s575_s11 }
  0x5d   :  { %663 = vmatprep.subr.bf16.mxu0 %v933_v0  ;;  %683 = vmatprep.subr.bf16.mxu1 %v933_v0  ;;  %v766_v12 = vld [vmem:[#allocation7 + $0x20] sm:$0xff]   ;;  %v760_v13 = vld [vmem:[#allocation5 + $0x38] sm:$0xff]   ;;  %v767_v14 = vld [vmem:[#allocation7 + $0x28] sm:$0xff]  }
  0x5e   :  { %v761_v15 = vld [vmem:[#allocation2] sm:$0xff]   ;;  %v768_v16 = vld [vmem:[#allocation7 + $0x30] sm:$0xff]   ;;  %v770_v18 = vld [vmem:[#allocation8] sm:$0xff]  }
  0x5f   :  { %v769_v17 = vld [vmem:[#allocation7 + $0x38] sm:$0xff]   ;;  %v771_v19 = vld [vmem:[#allocation8 + $0x8] sm:$0xff]   ;;  %v772_v20 = vld [vmem:[#allocation8 + $0x10] sm:$0xff]  }
  0x60   :  { %664 = vmatpush3.bf16.msra.mxu0 %v754_v2  ;;  %684 = vmatpush3.bf16.msra.mxu1 %v763_v6  ;;  %v773_v21 = vld [vmem:[#allocation8 + $0x18] sm:$0xff]   ;;  %v774_v22 = vld [vmem:[#allocation8 + $0x20] sm:$0xff]   ;;  %v775_v23 = vld [vmem:[#allocation8 + $0x28] sm:$0xff]  }
  0x61   :  { %665 = vmatprep.subr.bf16.mxu0 %v933_v0  ;;  %685 = vmatprep.subr.bf16.mxu1 %v933_v0  ;;  %v588_v24 = vld [vmem:[%s1143_s2] ss:$0 sm:$0xff]  ;;  %v776_v34 = vld [vmem:[#allocation8 + $0x30] sm:$0xff]   ;;  %v778_v36 = vld [vmem:[#allocation10] sm:$0xff]  }
  0x62   :  { %v777_v35 = vld [vmem:[#allocation8 + $0x38] sm:$0xff]   ;;  %v779_v37 = vld [vmem:[#allocation10 + $0x8] sm:$0xff]   ;;  %v780_v38 = vld [vmem:[#allocation10 + $0x10] sm:$0xff]  }
  0x63   :  { %v781_v39 = vld [vmem:[#allocation10 + $0x18] sm:$0xff]   ;;  %v782_v40 = vld [vmem:[#allocation10 + $0x20] sm:$0xff]   ;;  %v783_v41 = vld [vmem:[#allocation10 + $0x28] sm:$0xff]  }
  0x64   :  { %666 = vmatpush3.bf16.msra.mxu0 %v755_v3  ;;  %686 = vmatpush3.bf16.msra.mxu1 %v764_v8  ;;  %v598_v42 = vld [vmem:[%s1145_s4] ss:$0 sm:$0xff]  ;;  %v784_v52 = vld [vmem:[#allocation10 + $0x30] sm:$0xff]  }
  0x65   :  { %667 = vmatprep.subr.bf16.mxu0 %v933_v0  ;;  %687 = vmatprep.subr.bf16.mxu1 %v933_v0  ;;  %v785_v53 = vld [vmem:[#allocation10 + $0x38] sm:$0xff]  }
  0x66   :  { %v607_v54 = vld [vmem:[%s1147_s6] ss:$0 sm:$0xff]  ;;  %s896_s6 = scalar_lea.vmem %s575_s11, 256 }
  0x67   :  { %p897_p12 = scmp.ne.s32.totalorder %s575_s11, %s896_s6  ;;  %p902_p0 = scmp.lt.s32.totalorder %s896_s6, %s896_s6 }
  0x68   :  { %668 = vmatpush3.bf16.msra.mxu0 %v756_v5  ;;  %688 = vmatpush3.bf16.msra.mxu1 %v765_v10 }
  0x69   :  { %669 = vmatprep.subr.bf16.mxu0 %v933_v0  ;;  %689 = vmatprep.subr.bf16.mxu1 %v933_v0  ;;  %p903_p1 = por %p902_p0, %p901_p13 }
  0x6b   :  { %p904_p2 = pnand %p903_p1, %p897_p12 }
  0x6c   :  { %670 = vmatpush3.bf16.msra.mxu0 %v757_v7  ;;  %690 = vmatpush3.bf16.msra.mxu1 %v766_v12 }
  0x6d   :  { %671 = vmatprep.subr.bf16.mxu0 %v933_v0  ;;  %691 = vmatprep.subr.bf16.mxu1 %v933_v0 }
  0x70   :  { %672 = vmatpush3.bf16.msra.mxu0 %v758_v9  ;;  %692 = vmatpush3.bf16.msra.mxu1 %v767_v14 }
  0x71   :  { %673 = vmatprep.subr.bf16.mxu0 %v933_v0  ;;  %693 = vmatprep.subr.bf16.mxu1 %v933_v0 }
  0x74   :  { %674 = vmatpush3.bf16.msra.mxu0 %v759_v11  ;;  %694 = vmatpush3.bf16.msra.mxu1 %v768_v16 }
  0x75   :  { %675 = vmatprep.subr.bf16.mxu0 %v933_v0  ;;  %695 = vmatprep.subr.bf16.mxu1 %v933_v0 }
  0x78   :  { %676 = vmatpush3.bf16.msra.mxu0 %v760_v13  ;;  %696 = vmatpush3.bf16.msra.mxu1 %v769_v17 }
  0x79   :  { %701 = vmatprep.subr.bf16.mxu0 %v933_v0  ;;  %721 = vmatprep.subr.bf16.mxu1 %v933_v0 }
  0x7b   :  { %678 = vmatmul.mubr.bf16.vlgmr.msra.gmra.mrb[0].mxu0 %v761_v15 }
  0x7c   :  { %717 = vmatprep.mubr.msk.bf16.mxu0 %vm934_vm0, %v933_v0  ;;  %702 = vmatpush3.bf16.msra.mxu0 %v770_v18 }
  0x7d   :  { %703 = vmatprep.subr.bf16.mxu0 %v933_v0 }
  0x80   :  { %704 = vmatpush3.bf16.msra.mxu0 %v771_v19 }
  0x81   :  { %705 = vmatprep.subr.bf16.mxu0 %v933_v0 }
  0x84   :  { %706 = vmatpush3.bf16.msra.mxu0 %v772_v20 }
  0x85   :  { %707 = vmatprep.subr.bf16.mxu0 %v933_v0 }
  0x88   :  { %708 = vmatpush3.bf16.msra.mxu0 %v773_v21 }
  0x89   :  { %709 = vmatprep.subr.bf16.mxu0 %v933_v0 }
  0x8c   :  { %710 = vmatpush3.bf16.msra.mxu0 %v774_v22 }
  0x8d   :  { %711 = vmatprep.subr.bf16.mxu0 %v933_v0 }
  0x90   :  { %712 = vmatpush3.bf16.msra.mxu0 %v775_v23 }
  0x91   :  { %713 = vmatprep.subr.bf16.mxu0 %v933_v0 }
  0x94   :  { %714 = vmatpush3.bf16.msra.mxu0 %v776_v34 }
  0x95   :  { %715 = vmatprep.subr.bf16.mxu0 %v933_v0 }
  0x98   :  { %716 = vmatpush3.bf16.msra.mxu0 %v777_v35 }
 0x14e   :  { %v215_v25 = vpop.f32.mrb[0].mxu0 }
 0x14f   :  { %v216_v26 = vadd.f32 %v588_v24, %v215_v25  ;;  %v679_v27 = vpop.f32.mrb[1].mxu0 }
 0x150   :  { %v218_v28 = vpop.f32.mrb[2].mxu0 }
 0x151   :  { %v219_v29 = vadd.f32 %v588_v24, %v218_v28  ;;  %v680_v30 = vpop.f32.mrb[3].mxu0  ;;  %v222_v31 = vmax.f32 %v216_v26, 0.0 }
 0x153   :  { %v223_v32 = vmax.f32 %v219_v29, 0.0 }
 0x155   :  { %v224_v33 = vpack.c.bf16 %v223_v32, %v222_v31 }
 0x157   :  { %698 = vmatmul.mubr.bf16.vlgmr.msra.gmra.mrb[0].mxu1 %v224_v33 }
 0x158   :  { %737 = vmatprep.mubr.msk.bf16.mxu1 %vm934_vm0, %v933_v0  ;;  %722 = vmatpush3.bf16.msra.mxu1 %v778_v36 }
 0x159   :  { %723 = vmatprep.subr.bf16.mxu1 %v933_v0 }
 0x15c   :  { %724 = vmatpush3.bf16.msra.mxu1 %v779_v37 }
 0x15d   :  { %725 = vmatprep.subr.bf16.mxu1 %v933_v0 }
 0x160   :  { %726 = vmatpush3.bf16.msra.mxu1 %v780_v38 }
 0x161   :  { %727 = vmatprep.subr.bf16.mxu1 %v933_v0 }
 0x164   :  { %728 = vmatpush3.bf16.msra.mxu1 %v781_v39 }
 0x165   :  { %729 = vmatprep.subr.bf16.mxu1 %v933_v0 }
 0x168   :  { %730 = vmatpush3.bf16.msra.mxu1 %v782_v40 }
 0x169   :  { %731 = vmatprep.subr.bf16.mxu1 %v933_v0 }
 0x16c   :  { %732 = vmatpush3.bf16.msra.mxu1 %v783_v41 }
 0x16d   :  { %733 = vmatprep.subr.bf16.mxu1 %v933_v0 }
 0x170   :  { %734 = vmatpush3.bf16.msra.mxu1 %v784_v52 }
 0x171   :  { %735 = vmatprep.subr.bf16.mxu1 %v933_v0  ;;  %v616_v0 = vld [vmem:[%s1149_s8] ss:$0 sm:$0xff] }
 0x174   :  { %736 = vmatpush3.bf16.msra.mxu1 %v785_v53 }
 0x22a   :  { %v330_v43 = vpop.f32.mrb[0].mxu1 }
 0x22b   :  { %v331_v44 = vadd.f32 %v598_v42, %v330_v43  ;;  %v699_v45 = vpop.f32.mrb[1].mxu1 }
 0x22c   :  { %v333_v46 = vpop.f32.mrb[2].mxu1 }
 0x22d   :  { %v334_v47 = vadd.f32 %v598_v42, %v333_v46  ;;  %v700_v48 = vpop.f32.mrb[3].mxu1  ;;  %v337_v49 = vmax.f32 %v331_v44, 0.0 }
 0x22f   :  { %v338_v50 = vmax.f32 %v334_v47, 0.0 }
 0x231   :  { %v339_v51 = vpack.c.bf16 %v338_v50, %v337_v49 }
 0x233   :  { %718 = vmatmul.mubr.bf16.vlgmr.msra.gmra.mrb[4].mxu0 %v339_v51 }
 0x306   :  { %v445_v55 = vpop.f32.mrb[4].mxu0 }
 0x307   :  { %v446_v56 = vadd.f32 %v607_v54, %v445_v55  ;;  %v719_v57 = vpop.f32.mrb[5].mxu0 }
 0x308   :  { %v448_v58 = vpop.f32.mrb[6].mxu0 }
 0x309   :  { %v449_v59 = vadd.f32 %v607_v54, %v448_v58  ;;  %v720_v60 = vpop.f32.mrb[7].mxu0  ;;  %v452_v61 = vmax.f32 %v446_v56, 0.0 }
 0x30b   :  { %v453_v62 = vmax.f32 %v449_v59, 0.0 }
 0x30d   :  { %v454_v63 = vpack.c.bf16 %v453_v62, %v452_v61 }
 0x30f   :  { %738 = vmatmul.mubr.bf16.vlgmr.msra.gmra.mrb[4].mxu1 %v454_v63 }
 0x3e2   :  { %v560_v1 = vpop.f32.mrb[4].mxu1 }
 0x3e3   :  { %v561_v2 = vadd.f32 %v616_v0, %v560_v1  ;;  %v739_v3 = vpop.f32.mrb[5].mxu1 }
 0x3e4   :  { %v563_v4 = vpop.f32.mrb[6].mxu1 }
 0x3e5   :  { %567 = vst [vmem:[#allocation11] sm:$0xff] %v561_v2  ;;  %v564_v5 = vadd.f32 %v616_v0, %v563_v4  ;;  %v740_v6 = vpop.f32.mrb[7].mxu1 }
 0x3e7   :  { %568 = vst [vmem:[#allocation11 + $0x8] sm:$0xff] %v564_v5 }
 0x3e8   :  { %907 = shalt.err (!%p904_p2)
}
 0x3e9   :  { %s908_s1 = scalar_lea.hbm %s1150_s9, 256 }
 0x3ea   :  { %p909_p3 = scmp.ne.s32.totalorder %s1150_s9, %s908_s1  ;;  %p912_p4 = scmp.lt.u32.totalorder %s908_s1, %s1150_s9 }
 0x3ec   :  { %p914_p5 = pnand %p912_p4, %p909_p3 }
 0x3ee   :  { %917 = shalt.err (!%p914_p5)
}
 0x3ef   :  { %s936_s16 = smov 128   ;;  %s937_s18 = smov 8  }
 0x3f0   :  { %580 = dma.vmem_to_hbm [thread:$0]  %s575_s11, 256, %s1150_s9, [#allocation4], %s936_s16, %s936_s16, %s937_s18  }
 0x3f1   :  { %924 = dma.done.wait [#allocation4], 256  }
 0x3f2   :  { %925 = vsyncadd [#allocation4], 4294967040 }
 0x3f3   :  { %584 = vsyncpa [#allocation3], 1 }
 0x3f4   :  { %585 = vsyncpa [#allocation6], 1 }
 0x3f5   :  { %586 = vsyncpa [#allocation9], 1 }
 0x3f6   :  { %587 = vsyncpa [#allocation4], 1 }

</bundles_post_ra>
